<compile_context>
chip_gen: v7x
topology: tpu7x:2x2x1
jax: 0.10.0
libtpu: 0.0.40
codegen_flags: <defaults>
</compile_context>

<pallas_src>
import functools

import jax
import jax.numpy as jnp
from jax import lax
from jax.experimental import pallas as pl
from jax.experimental.pallas import tpu as pltpu

EPS = 1e-5          # nn.BatchNorm2d default eps
_LANE = 128         # feature dims padded to multiples of the TPU lane width


def _round_up(a, b):
    return (a + b - 1) // b * b


def _vmem_capacity():
    """Physical VMEM capacity (bytes), conservative fallback if query fails."""
    cap = 64 << 20                                   # v7x per-TC (the smallest)
    try:
        info = pltpu.get_tpu_info()
        v = getattr(info, "vmem_capacity_bytes", None)
        if v:
            cap = int(v)
    except Exception:
        pass
    return max(32 << 20, min(cap, 128 << 20))


def _row_tile_cap(in_dim, hid_p, n_row_arrays, capacity):
    """Max rows per tile given VMEM capacity (accounts for hid_p intermediates)."""
    max_tn = 2048 if capacity >= (96 << 20) else 1024
    budget = max(4 << 20, capacity // 4)
    # double-buffered row arrays (x, out[, noise]) + ~4 live (tn, hid_p) f32 temps
    per_row = 4 * (2 * n_row_arrays * in_dim + 4 * hid_p)
    cap = (budget // per_row) // 8 * 8
    return int(max(8, min(max_tn, cap)))


def _vmem_limit(tn, in_dim, hid_p, n_row_arrays, w_bytes, capacity):
    tile = n_row_arrays * tn * in_dim * 4 * 2            # row-tiled arrays, 2 bufs
    interm = 4 * tn * hid_p * 4                          # h / r / operand casts
    consts = (2 * in_dim * hid_p * w_bytes + 16 * (in_dim + hid_p) * 4) * 2
    limit = int(1.3 * (tile + interm + consts)) + (4 << 20)
    hi = max(16 << 20, int(0.75 * capacity))             # ~96 MiB v5e/v6e, 48 MiB v7x
    return int(max(16 << 20, min(limit, hi)))


def _plan_rows(n, feat_ok, tn_cap):
    """Choose (tile_rows, total_rows, rows_padded) for the B*T row axis."""
    if n <= tn_cap:
        if feat_ok:
            return n, n, False                  # single full-row block, no copies
        n8 = _round_up(n, 8)
        return n8, n8, n8 != n
    if feat_ok and n % 8 == 0:
        # largest multiple-of-8 divisor of n that fits the cap -> no row padding
        for tn in range(tn_cap, 7, -8):
            if n % tn == 0:
                if tn >= max(64, tn_cap // 4):
                    return tn, n, False
                break
    tn = max(8, tn_cap)
    return tn, _round_up(n, tn), True


def _stats_kernel(n_valid, n_rows, tn, tiles_per_split, compute_dtype,
                  x_ref, noise_ref, w1t_ref, b1_ref, sum_ref, sumsq_ref):
    """Per-feature sum / sum-of-squares of relu(fc1(relu(x + noise)))."""
    c = pl.program_id(0)          # parallel split (2-way where 2 TCs exist)
    t = pl.program_id(1)          # reduction over row tiles

    @pl.when(t == 0)
    def _():
        sum_ref[...] = jnp.zeros_like(sum_ref)
        sumsq_ref[...] = jnp.zeros_like(sumsq_ref)

    a = jnp.maximum(x_ref[...] + noise_ref[...], 0.0)
    h = jnp.dot(a.astype(compute_dtype), w1t_ref[...],
                preferred_element_type=jnp.float32) + b1_ref[...]
    r = jnp.maximum(h, 0.0)

    def accum(v):
        sum_ref[...] += jnp.sum(v, axis=0, keepdims=True)
        sumsq_ref[...] += jnp.sum(v * v, axis=0, keepdims=True)

    if n_rows == n_valid:                       # static: no zero-padded rows
        accum(r)
    else:
        gi = c * tiles_per_split + t            # global row-tile index
        is_last = gi == (n_rows // tn - 1)      # only tile containing padding

        @pl.when(jnp.logical_not(is_last))
        def _():
            accum(r)

        @pl.when(is_last)
        def _():
            rows = gi * tn + lax.broadcasted_iota(jnp.int32, r.shape, 0)
            accum(jnp.where(rows < n_valid, r, 0.0))


def _apply_kernel(has_noise, compute_dtype, *refs):
    """out = x + relu(fc1(relu(x [+ noise]))) @ w2t_eff + b2_eff (BN pre-folded)."""
    if has_noise:
        x_ref, noise_ref, w1t_ref, b1_ref, w2t_ref, b2_ref, out_ref = refs
        a = jnp.maximum(x_ref[...] + noise_ref[...], 0.0)
    else:
        x_ref, w1t_ref, b1_ref, w2t_ref, b2_ref, out_ref = refs
        a = jnp.maximum(x_ref[...], 0.0)

    h = jnp.dot(a.astype(compute_dtype), w1t_ref[...],
                preferred_element_type=jnp.float32) + b1_ref[...]
    r = jnp.maximum(h, 0.0)
    out_ref[...] = x_ref[...] + jnp.dot(r.astype(compute_dtype), w2t_ref[...],
                                        preferred_element_type=jnp.float32) + b2_ref[...]


def resnet_forward(x, params, training, noise=None, matmul_dtype=jnp.float32):
    """x: (B, T, in_size) float32.  noise: pre-drawn 0.2*randn(x.shape) when training."""
    B, T, in_size = x.shape
    hid_size = params["w1"].shape[0]
    N = B * T
    hid_p = _round_up(hid_size, _LANE)
    feat_ok = (in_size % _LANE == 0)
    in_dim = in_size if feat_ok else _round_up(in_size, _LANE)
    n_row_arrays = 3 if training else 2              # x, out (+ noise)

    capacity = _vmem_capacity()
    w_bytes = jnp.dtype(matmul_dtype).itemsize
    tn_cap = _row_tile_cap(in_dim, hid_p, n_row_arrays, capacity)
    tn, n_rows, pad_rows = _plan_rows(N, feat_ok, tn_cap)
    need_copy = (not feat_ok) or pad_rows            # must pad x / slice output
    g = n_rows // tn
    vlimit = _vmem_limit(tn, in_dim, hid_p, n_row_arrays, w_bytes, capacity)

    def pad2(a, rows, cols):
        a = jnp.asarray(a, jnp.float32)
        return jnp.pad(a, ((0, rows - a.shape[0]), (0, cols - a.shape[1])))

    def pad_row(v, cols, fill=0.0):
        v = jnp.asarray(v, jnp.float32).reshape(1, -1)
        return jnp.pad(v, ((0, 0), (0, cols - v.shape[1])), constant_values=fill)

    # Weights / biases: padded once, weights pre-cast to the MXU operand dtype.
    w1t = pad2(jnp.asarray(params["w1"]).T, in_dim, hid_p)        # (in_dim, hid_p)
    b1 = pad_row(params["b1"], hid_p)
    w2t = pad2(jnp.asarray(params["w2"]).T, hid_p, in_dim)        # (hid_p, in_dim)
    b2 = pad_row(params["b2"], in_dim)
    gamma = pad_row(params["gamma"], hid_p)
    beta = pad_row(params["beta"], hid_p)
    w1t_mx = w1t.astype(matmul_dtype)

    # Activations: only copied when feature/row padding is actually required.
    x2 = jnp.asarray(x, jnp.float32).reshape(N, in_size)
    if need_copy:
        x2 = pad2(x2, n_rows, in_dim)
    if training:
        if noise is None:
            raise ValueError("training=True requires a pre-drawn noise tensor")
        nz2 = jnp.asarray(noise, jnp.float32).reshape(N, in_size)
        if need_copy:
            nz2 = pad2(nz2, n_rows, in_dim)

    row_spec = pl.BlockSpec((tn, in_dim), lambda i: (i, 0))
    const_spec = lambda r, c: pl.BlockSpec((r, c), lambda i: (0, 0))

    if training:
        # Pass 1: per-feature batch statistics.  Leading 2-wide "parallel" axis
        # lets both TensorCores work on v7x; cost-free on single-TC chips.
        split = 2 if (g >= 2 and g % 2 == 0) else 1
        gh = g // split
        row_spec2 = pl.BlockSpec((tn, in_dim), lambda c, t: (c * gh + t, 0))
        const_spec2 = lambda r, cc: pl.BlockSpec((r, cc), lambda c, t: (0, 0))
        out_spec2 = pl.BlockSpec((1, hid_p), lambda c, t: (c, 0))

        sum_parts, sumsq_parts = pl.pallas_call(
            functools.partial(_stats_kernel, N, n_rows, tn, gh, matmul_dtype),
            out_shape=(jax.ShapeDtypeStruct((split, hid_p), jnp.float32),
                       jax.ShapeDtypeStruct((split, hid_p), jnp.float32)),
            grid=(split, gh),
            in_specs=[row_spec2, row_spec2,
                      const_spec2(in_dim, hid_p), const_spec2(1, hid_p)],
            out_specs=(out_spec2, out_spec2),
            compiler_params=pltpu.CompilerParams(
                dimension_semantics=("parallel", "arbitrary"),
                vmem_limit_bytes=vlimit),
        )(x2, nz2, w1t_mx, b1)
        sum_r = jnp.sum(sum_parts, axis=0, keepdims=True)
        sum_r2 = jnp.sum(sumsq_parts, axis=0, keepdims=True)
        mean = sum_r / N
        var = jnp.maximum(sum_r2 / N - mean * mean, 0.0)   # biased, as torch BN
    else:
        mean = pad_row(params["running_mean"], hid_p)
        var = pad_row(params["running_var"], hid_p, fill=1.0)

    # Fold BN all the way into fc2 (in f32, before any bf16 cast):
    #   out = x + relu(h) @ (scale * w2t) + (shift @ w2t + b2)
    scale = gamma * lax.rsqrt(var + EPS)                   # (1, hid_p)
    shift = beta - mean * scale                            # (1, hid_p)
    w2t_eff = scale.reshape(hid_p, 1) * w2t                # (hid_p, in_dim), f32
    b2_eff = shift @ w2t + b2                              # (1, in_dim), f32
    w2t_mx = w2t_eff.astype(matmul_dtype)

    if training:
        args = (x2, nz2, w1t_mx, b1, w2t_mx, b2_eff)
        in_specs = [row_spec, row_spec, const_spec(in_dim, hid_p),
                    const_spec(1, hid_p), const_spec(hid_p, in_dim),
                    const_spec(1, in_dim)]
    else:
        # Eval: no zero-noise tensor is materialized or DMA'd.
        args = (x2, w1t_mx, b1, w2t_mx, b2_eff)
        in_specs = [row_spec, const_spec(in_dim, hid_p), const_spec(1, hid_p),
                    const_spec(hid_p, in_dim), const_spec(1, in_dim)]

    out_cols = in_dim if need_copy else in_size
    out = pl.pallas_call(
        functools.partial(_apply_kernel, bool(training), matmul_dtype),
        out_shape=jax.ShapeDtypeStruct((n_rows, out_cols), jnp.float32),
        grid=(g,),
        in_specs=in_specs,
        out_specs=row_spec,
        compiler_params=pltpu.CompilerParams(
            dimension_semantics=("parallel",),
            vmem_limit_bytes=vlimit),
    )(*args)

    if need_copy:
        out = out[:N, :in_size]
    return out.reshape(B, T, in_size)


def init_params(key, in_size, hid_size):
    """Deterministic init mirroring nn.Linear / nn.BatchNorm2d defaults."""
    k1, k2, k3, k4 = jax.random.split(key, 4)
    lim1 = 1.0 / jnp.sqrt(jnp.float32(in_size))
    lim2 = 1.0 / jnp.sqrt(jnp.float32(hid_size))
    return {
        "w1": jax.random.uniform(k1, (hid_size, in_size), jnp.float32, -lim1, lim1),
        "b1": jax.random.uniform(k2, (hid_size,), jnp.float32, -lim1, lim1),
        "w2": jax.random.uniform(k3, (in_size, hid_size), jnp.float32, -lim2, lim2),
        "b2": jax.random.uniform(k4, (in_size,), jnp.float32, -lim2, lim2),
        "gamma": jnp.ones((hid_size,), jnp.float32),
        "beta": jnp.zeros((hid_size,), jnp.float32),
        "running_mean": jnp.zeros((hid_size,), jnp.float32),
        "running_var": jnp.ones((hid_size,), jnp.float32),
    }


def reference_forward(x, params, training, noise):
    """Pure-JAX f32 reference of the PyTorch forward (same noise tensor)."""
    nz = noise if training else jnp.zeros_like(x)
    a = jnp.maximum(x + nz, 0.0)
    h = a @ params["w1"].T + params["b1"]
    r = jnp.maximum(h, 0.0)                      # (B, T, hid)
    if training:
        mean = jnp.mean(r, axis=(0, 1))
        var = jnp.mean((r - mean) ** 2, axis=(0, 1))
    else:
        mean, var = params["running_mean"], params["running_var"]
    rn = (r - mean) / jnp.sqrt(var + EPS) * params["gamma"] + params["beta"]
    return x + rn @ params["w2"].T + params["b2"]


if __name__ == "__main__":
    key = jax.random.PRNGKey(0)
    kp, kx, kn, kp2, kx2, kn2 = jax.random.split(key, 6)

    # Small shapes implied by the module: (B, T, in_size) with a hidden expansion.
    B, T, in_size, hid_size = 2, 8, 16, 32
    params = init_params(kp, in_size, hid_size)
    x = jax.random.normal(kx, (B, T, in_size), jnp.float32)
    noise = 0.2 * jax.random.normal(kn, (B, T, in_size), jnp.float32)

    # eval path: no noise tensor, BN folded from running statistics
    out_eval = resnet_forward(x, params, training=False)
    jax.block_until_ready(out_eval)

    # training path: pre-drawn noise, BN batch statistics via reduction kernel
    out_train = resnet_forward(x, params, training=True, noise=noise)
    jax.block_until_ready(out_train)

    ref_eval = reference_forward(x, params, False, noise)
    ref_train = reference_forward(x, params, True, noise)
    assert out_eval.shape == (B, T, in_size)
    assert jnp.allclose(out_eval, ref_eval, atol=1e-4, rtol=1e-4)
    assert jnp.allclose(out_train, ref_train, atol=1e-4, rtol=1e-4)

    # bf16 MXU-operand fast path (weights pre-cast once in the wrapper), checked
    # against the f32 reference at a correspondingly looser tolerance.
    out_bf16 = resnet_forward(x, params, training=False, matmul_dtype=jnp.bfloat16)
    jax.block_until_ready(out_bf16)
    assert jnp.allclose(out_bf16, ref_eval, atol=5e-2, rtol=5e-2)

    # Lane-aligned fast path: in_size % 128 == 0 -> x/noise/out flow through the
    # kernels without any wrapper-side pad/slice copies.
    B2, T2, in2, hid2 = 2, 8, 128, 64
    params2 = init_params(kp2, in2, hid2)
    x_fast = jax.random.normal(kx2, (B2, T2, in2), jnp.float32)
    noise_fast = 0.2 * jax.random.normal(kn2, (B2, T2, in2), jnp.float32)
    out2_eval = resnet_forward(x_fast, params2, training=False)
    out2_train = resnet_forward(x_fast, params2, training=True, noise=noise_fast)
    jax.block_until_ready((out2_eval, out2_train))
    assert jnp.allclose(out2_eval, reference_forward(x_fast, params2, False, noise_fast),
                        atol=1e-3, rtol=1e-3)
    assert jnp.allclose(out2_train, reference_forward(x_fast, params2, True, noise_fast),
                        atol=1e-3, rtol=1e-3)

    print("KERNEL_OK")
</pallas_src>

<mosaic_0001>
module attributes {stable_mosaic.version = 11 : i64} {
  func.func @_apply_kernel(%arg0: i32, %arg1: memref<16x128xf32, #tpu.memory_space<vmem>>, %arg2: memref<128x128xf32, #tpu.memory_space<vmem>>, %arg3: memref<1x128xf32, #tpu.memory_space<vmem>>, %arg4: memref<128x128xf32, #tpu.memory_space<vmem>>, %arg5: memref<1x128xf32, #tpu.memory_space<vmem>>, %arg6: memref<16x128xf32, #tpu.memory_space<vmem>>) attributes {dimension_semantics = [#tpu.dimension_semantics<parallel>], iteration_bounds = array<i64: 1>, scalar_prefetch = 0 : i64, scratch_operands = 0 : i64, tpu.core_type = #tpu.core_type<tc>, window_params = [{transform_indices = @transform_0, window_bounds = array<i64: 16, 128>}, {pipeline_mode = #tpu.pipeline_mode<synchronous>, transform_indices = @transform_1, window_bounds = array<i64: 128, 128>}, {pipeline_mode = #tpu.pipeline_mode<synchronous>, transform_indices = @transform_2, window_bounds = array<i64: 1, 128>}, {pipeline_mode = #tpu.pipeline_mode<synchronous>, transform_indices = @transform_3, window_bounds = array<i64: 128, 128>}, {pipeline_mode = #tpu.pipeline_mode<synchronous>, transform_indices = @transform_4, window_bounds = array<i64: 1, 128>}, {transform_indices = @transform_5, window_bounds = array<i64: 16, 128>}]} {
    %c0 = arith.constant 0 : index
    %c0_0 = arith.constant 0 : index
    %0 = vector.load %arg1[%c0, %c0_0] : memref<16x128xf32, #tpu.memory_space<vmem>>, vector<16x128xf32>
    %cst = arith.constant 0.000000e+00 : f32
    %1 = vector.broadcast %cst : f32 to vector<16x128xf32>
    %2 = arith.maximumf %0, %1 : vector<16x128xf32>
    %c0_1 = arith.constant 0 : index
    %c0_2 = arith.constant 0 : index
    %3 = vector.load %arg2[%c0_1, %c0_2] : memref<128x128xf32, #tpu.memory_space<vmem>>, vector<128x128xf32>
    %cst_3 = arith.constant dense<0.000000e+00> : vector<16x128xf32>
    %4 = tpu.matmul %2, %3, %cst_3 {dimension_numbers = #tpu.dot_dimension_numbers<[1], [0], [0], [1], [0, 0, 1, 1], [], []>} : vector<16x128xf32>, vector<128x128xf32>, vector<16x128xf32> -> vector<16x128xf32>
    %c0_4 = arith.constant 0 : index
    %c0_5 = arith.constant 0 : index
    %5 = vector.load %arg3[%c0_4, %c0_5] : memref<1x128xf32, #tpu.memory_space<vmem>>, vector<1x128xf32>
    %6 = vector.broadcast %5 : vector<1x128xf32> to vector<16x128xf32>
    %7 = arith.addf %4, %6 : vector<16x128xf32>
    %cst_6 = arith.constant 0.000000e+00 : f32
    %8 = vector.broadcast %cst_6 : f32 to vector<16x128xf32>
    %9 = arith.maximumf %7, %8 : vector<16x128xf32>
    %c0_7 = arith.constant 0 : index
    %c0_8 = arith.constant 0 : index
    %10 = vector.load %arg1[%c0_7, %c0_8] : memref<16x128xf32, #tpu.memory_space<vmem>>, vector<16x128xf32>
    %c0_9 = arith.constant 0 : index
    %c0_10 = arith.constant 0 : index
    %11 = vector.load %arg4[%c0_9, %c0_10] : memref<128x128xf32, #tpu.memory_space<vmem>>, vector<128x128xf32>
    %cst_11 = arith.constant dense<0.000000e+00> : vector<16x128xf32>
    %12 = tpu.matmul %9, %11, %cst_11 {dimension_numbers = #tpu.dot_dimension_numbers<[1], [0], [0], [1], [0, 0, 1, 1], [], []>} : vector<16x128xf32>, vector<128x128xf32>, vector<16x128xf32> -> vector<16x128xf32>
    %13 = arith.addf %10, %12 : vector<16x128xf32>
    %c0_12 = arith.constant 0 : index
    %c0_13 = arith.constant 0 : index
    %14 = vector.load %arg5[%c0_12, %c0_13] : memref<1x128xf32, #tpu.memory_space<vmem>>, vector<1x128xf32>
    %15 = vector.broadcast %14 : vector<1x128xf32> to vector<16x128xf32>
    %16 = arith.addf %13, %15 : vector<16x128xf32>
    %c0_14 = arith.constant 0 : index
    %c0_15 = arith.constant 0 : index
    %17 = vector.load %arg6[%c0_14, %c0_15] : memref<16x128xf32, #tpu.memory_space<vmem>>, vector<16x128xf32>
    tpu.vector_store %arg6[%c0_14, %c0_15], %16 {strides = array<i32>} : memref<16x128xf32, #tpu.memory_space<vmem>>, vector<16x128xf32>,
    return
  }
  func.func @transform_0(%arg0: i32) -> (i32, i32) {
    %c0_i32 = arith.constant 0 : i32
    %c0_i32_0 = arith.constant 0 : i32
    return %arg0, %c0_i32 : i32, i32
  }
  func.func @transform_1(%arg0: i32) -> (i32, i32) {
    %c0_i32 = arith.constant 0 : i32
    %c0_i32_0 = arith.constant 0 : i32
    %c0_i32_1 = arith.constant 0 : i32
    return %c0_i32, %c0_i32_0 : i32, i32
  }
  func.func @transform_2(%arg0: i32) -> (i32, i32) {
    %c0_i32 = arith.constant 0 : i32
    %c0_i32_0 = arith.constant 0 : i32
    %c0_i32_1 = arith.constant 0 : i32
    return %c0_i32, %c0_i32_0 : i32, i32
  }
  func.func @transform_3(%arg0: i32) -> (i32, i32) {
    %c0_i32 = arith.constant 0 : i32
    %c0_i32_0 = arith.constant 0 : i32
    %c0_i32_1 = arith.constant 0 : i32
    return %c0_i32, %c0_i32_0 : i32, i32
  }
  func.func @transform_4(%arg0: i32) -> (i32, i32) {
    %c0_i32 = arith.constant 0 : i32
    %c0_i32_0 = arith.constant 0 : i32
    %c0_i32_1 = arith.constant 0 : i32
    return %c0_i32, %c0_i32_0 : i32, i32
  }
  func.func @transform_5(%arg0: i32) -> (i32, i32) {
    %c0_i32 = arith.constant 0 : i32
    %c0_i32_0 = arith.constant 0 : i32
    return %arg0, %c0_i32 : i32, i32
  }
}

</mosaic_0001>

<bundles_post_ra>
// kernel: tpu_custom_call.1
= control target key start
LH: loop header
LB: loop body
LE: loop exit
PB: predicated region body
PF: predicated region fallthrough
CT: control target
= control target key end

     0   :  { %10 = vsyncpa [#allocation3], 0  ;;  %s673_s0 = inlined_call_operand.hbm [shape: f32[16,128], index: 0, kind: input, shape index: {}]   ;;  %s674_s1 = inlined_call_operand.hbm [shape: f32[128,128], index: 1, kind: input, shape index: {}]   ;;  %s675_s2 = inlined_call_operand.vmem [shape: f32[1,128], index: 2, kind: input, shape index: {}]   ;;  %s676_s3 = inlined_call_operand.hbm [shape: f32[128,128], index: 3, kind: input, shape index: {}]   ;;  %s677_s4 = inlined_call_operand.vmem [shape: f32[1,128], index: 4, kind: input, shape index: {}]   ;;  %s678_s5 = inlined_call_operand.hbm [shape: f32[16,128], index: 5, kind: output, shape index: {}]  }
   0x1   :  { %11 = vsyncpa [#allocation6], 0 }
   0x2   :  { %12 = vsyncpa [#allocation4], 0  ;;  %s560_s18 = smov [#allocation5]   ;;  %s561_s20 = smov [#allocation2]  }
   0x3   :  { %s30_s19 = sshll.u32 %s560_s18, 4  ;;  %s18_s21 = sshll.u32 %s561_s20, 4  ;;  %s31_s19 = int_to_ptr.vmem [resolvable:$true] %s30_s19  ;;  %s596_s21 = int_to_ptr.vmem [resolvable:$true] %s18_s21 }
   0x4   :  { %s466_s24 = scalar_lea.hbm %s674_s1, 2048 }
   0x5   :  { %p467_p0 = scmp.ne.s32.totalorder %s674_s1, %s466_s24  ;;  %p470_p1 = scmp.lt.u32.totalorder %s466_s24, %s674_s1 }
   0x7   :  { %p472_p2 = pnand %p470_p1, %p467_p0 }
   0x9   :  { %475 = shalt.err (!%p472_p2)
}
   0xa   :  { %s476_s29 = scalar_lea.vmem %s31_s19, 2048  ;;  %p481_p4 = scmp.lt.s32.totalorder %s31_s19, %s31_s19 }
   0xb   :  { %p477_p3 = scmp.ne.s32.totalorder %s31_s19, %s476_s29  ;;  %p482_p5 = scmp.lt.s32.totalorder %s476_s29, %s476_s29 }
   0xd   :  { %p483_p6 = por %p482_p5, %p481_p4 }
   0xf   :  { %p484_p7 = pnand %p483_p6, %p477_p3 }
  0x11   :  { %487 = shalt.err (!%p484_p7)
}
  0x12   :  { %s562_s30 = smov 128   ;;  %s563_s6 = smov 8  }
  0x13   :  { %36 = dma.hbm_to_vmem [thread:$0]  %s674_s1, 2048, %s31_s19, [#allocation6], %s562_s30, %s562_s30, %s563_s6  }
  0x14   :  { %s488_s11 = scalar_lea.hbm %s673_s0, 256 }
  0x15   :  { %p489_p8 = scmp.ne.s32.totalorder %s673_s0, %s488_s11  ;;  %p492_p9 = scmp.lt.u32.totalorder %s488_s11, %s673_s0 }
  0x17   :  { %p494_p10 = pnand %p492_p9, %p489_p8 }
  0x19   :  { %497 = shalt.err (!%p494_p10)
}
  0x1a   :  { %s498_s16 = scalar_lea.vmem %s596_s21, 256  ;;  %p503_p12 = scmp.lt.s32.totalorder %s596_s21, %s596_s21 }
  0x1b   :  { %p499_p11 = scmp.ne.s32.totalorder %s596_s21, %s498_s16  ;;  %p504_p13 = scmp.lt.s32.totalorder %s498_s16, %s498_s16 }
  0x1d   :  { %p505_p0 = por %p504_p13, %p503_p12 }
  0x1f   :  { %p506_p1 = pnand %p505_p0, %p499_p11 }
  0x21   :  { %509 = shalt.err (!%p506_p1)
}
  0x22   :  { %24 = dma.hbm_to_vmem [thread:$0]  %s673_s0, 256, %s596_s21, [#allocation3], %s562_s30, %s562_s30, %s563_s6  }
  0x23   :  { %s564_s18 = smov [#allocation7]   ;;  %s510_s23 = scalar_lea.hbm %s676_s3, 2048 }
  0x24   :  { %s44_s19 = sshll.u32 %s564_s18, 4  ;;  %p511_p2 = scmp.ne.s32.totalorder %s676_s3, %s510_s23  ;;  %s45_s19 = int_to_ptr.vmem [resolvable:$true] %s44_s19 }
  0x25   :  { %p514_p3 = scmp.lt.u32.totalorder %s510_s23, %s676_s3 }
  0x27   :  { %p516_p4 = pnand %p514_p3, %p511_p2 }
  0x29   :  { %519 = shalt.err (!%p516_p4)
}
  0x2a   :  { %s520_s28 = scalar_lea.vmem %s45_s19, 2048  ;;  %p525_p6 = scmp.lt.s32.totalorder %s45_s19, %s45_s19 }
  0x2b   :  { %p521_p5 = scmp.ne.s32.totalorder %s45_s19, %s520_s28  ;;  %p526_p7 = scmp.lt.s32.totalorder %s520_s28, %s520_s28 }
  0x2d   :  { %p527_p8 = por %p526_p7, %p525_p6 }
  0x2f   :  { %p528_p9 = pnand %p527_p8, %p521_p5 }
  0x31   :  { %531 = shalt.err (!%p528_p9)
}
  0x32   :  { %50 = dma.hbm_to_vmem [thread:$0]  %s676_s3, 2048, %s45_s19, [#allocation6], %s562_s30, %s562_s30, %s563_s6  }
  0x33   :  { %554 = dma.done.wait [#allocation3], 256  }
  0x34   :  { %555 = vsyncadd [#allocation3], 4294967040 }
  0x35   :  { %556 = dma.done.wait [#allocation6], 4096  }
  0x36   :  { %557 = vsyncadd [#allocation6], 4294963200  ;;  %v66_v0 = vld [vmem:[#allocation5] sm:$0xff]  ;;  %v67_v1 = vld [vmem:[#allocation5 + $0x8] sm:$0xff]  ;;  %s565_s9 = smov [#allocation8]  }
  0x37   :  { %v68_v2 = vld [vmem:[#allocation5 + $0x10] sm:$0xff]  ;;  %v396_v3 = vpack.c.bf16 %v67_v1, %v66_v0  ;;  %v69_v4 = vld [vmem:[#allocation5 + $0x18] sm:$0xff]  ;;  %v70_v6 = vld [vmem:[#allocation5 + $0x20] sm:$0xff]  ;;  %s275_s10 = sshll.u32 %s565_s9, 4  ;;  %s276_s10 = int_to_ptr.vmem [resolvable:$true] %s275_s10 }
  0x38   :  { %v400_v5 = vpack.c.bf16 %v69_v4, %v68_v2  ;;  %v71_v7 = vld [vmem:[#allocation5 + $0x28] sm:$0xff]  ;;  %v72_v9 = vld [vmem:[#allocation5 + $0x30] sm:$0xff]  ;;  %v73_v10 = vld [vmem:[#allocation5 + $0x38] sm:$0xff]  ;;  %p537_p11 = scmp.lt.s32.totalorder %s276_s10, %s276_s10 }
  0x39   :  { %397 = vmatprep.subr.bf16.mxu0 %v396_v3  ;;  %v404_v8 = vpack.c.bf16 %v71_v7, %v70_v6  ;;  %v648_v11 = vld [vmem:[#allocation2] sm:$0xff]  ;;  %v166_v13 = vld [vmem:[#allocation7] sm:$0xff]  ;;  %v167_v14 = vld [vmem:[#allocation7 + $0x8] sm:$0xff]  ;;  %v408_v21 = vpack.c.bf16 %v73_v10, %v72_v9 }
  0x3a   :  { %399 = vmatpush3.bf16.msra.mxu0 %v396_v3  ;;  %v64_v12 = vmax.f32 %v648_v11, 0.0  ;;  %v168_v15 = vld [vmem:[#allocation7 + $0x10] sm:$0xff]  ;;  %v428_v16 = vpack.c.bf16 %v167_v14, %v166_v13  ;;  %v169_v17 = vld [vmem:[#allocation7 + $0x18] sm:$0xff]  ;;  %v170_v19 = vld [vmem:[#allocation7 + $0x20] sm:$0xff] }
  0x3b   :  { %401 = vmatprep.subr.bf16.mxu0 %v400_v5  ;;  %v432_v18 = vpack.c.bf16 %v169_v17, %v168_v15  ;;  %v171_v20 = vld [vmem:[#allocation7 + $0x28] sm:$0xff]  ;;  %v74_v22 = vld [vmem:[#allocation5 + $0x40] sm:$0xff]  ;;  %v172_v25 = vld [vmem:[#allocation7 + $0x30] sm:$0xff] }
  0x3c   :  { %358 = vmatprep.mubr.f32.mxu0 %v64_v12  ;;  %429 = vmatprep.subr.bf16.mxu1 %v428_v16  ;;  %v75_v23 = vld [vmem:[#allocation5 + $0x48] sm:$0xff]  ;;  %v436_v24 = vpack.c.bf16 %v171_v20, %v170_v19  ;;  %v173_v26 = vld [vmem:[#allocation7 + $0x38] sm:$0xff]  ;;  %v76_v28 = vld [vmem:[#allocation5 + $0x50] sm:$0xff] }
  0x3d   :  { %431 = vmatpush3.bf16.msra.mxu1 %v428_v16  ;;  %v412_v27 = vpack.c.bf16 %v75_v23, %v74_v22  ;;  %v77_v29 = vld [vmem:[#allocation5 + $0x58] sm:$0xff]  ;;  %v440_v30 = vpack.c.bf16 %v173_v26, %v172_v25  ;;  %v174_v31 = vld [vmem:[#allocation7 + $0x40] sm:$0xff]  ;;  %v175_v32 = vld [vmem:[#allocation7 + $0x48] sm:$0xff] }
  0x3e   :  { %403 = vmatpush3.bf16.msra.mxu0 %v400_v5  ;;  %433 = vmatprep.subr.bf16.mxu1 %v432_v18  ;;  %v416_v33 = vpack.c.bf16 %v77_v29, %v76_v28  ;;  %v78_v34 = vld [vmem:[#allocation5 + $0x60] sm:$0xff]  ;;  %v79_v35 = vld [vmem:[#allocation5 + $0x68] sm:$0xff]  ;;  %v444_v36 = vpack.c.bf16 %v175_v32, %v174_v31  ;;  %v176_v37 = vld [vmem:[#allocation7 + $0x50] sm:$0xff] }
  0x3f   :  { %405 = vmatprep.subr.bf16.mxu0 %v404_v8  ;;  %v177_v38 = vld [vmem:[#allocation7 + $0x58] sm:$0xff]  ;;  %v420_v39 = vpack.c.bf16 %v79_v35, %v78_v34  ;;  %v80_v40 = vld [vmem:[#allocation5 + $0x70] sm:$0xff]  ;;  %v178_v43 = vld [vmem:[#allocation7 + $0x60] sm:$0xff] }
  0x40   :  { %v81_v41 = vld [vmem:[#allocation5 + $0x78] sm:$0xff]  ;;  %v448_v42 = vpack.c.bf16 %v177_v38, %v176_v37  ;;  %v179_v44 = vld [vmem:[#allocation7 + $0x68] sm:$0xff]  ;;  %v180_v49 = vld [vmem:[#allocation7 + $0x70] sm:$0xff] }
  0x41   :  { %435 = vmatpush3.bf16.msra.mxu1 %v432_v18  ;;  %v424_v45 = vpack.c.bf16 %v81_v41, %v80_v40  ;;  %v452_v46 = vpack.c.bf16 %v179_v44, %v178_v43  ;;  %v63_v47 = vld [vmem:[#allocation2 + $0x8] sm:$0xff]  ;;  %v288_v52 = vld [vmem:[%s675_s2] ss:$0 sm:$0xff]  ;;  %s532_s2 = scalar_lea.vmem %s276_s10, 256 }
  0x42   :  { %407 = vmatpush3.bf16.msra.mxu0 %v404_v8  ;;  %437 = vmatprep.subr.bf16.mxu1 %v436_v24  ;;  %v65_v48 = vmax.f32 %v63_v47, 0.0  ;;  %v181_v50 = vld [vmem:[#allocation7 + $0x78] sm:$0xff]  ;;  %v289_v60 = vld [vmem:[%s677_s4] ss:$0 sm:$0xff]  ;;  %p533_p10 = scmp.ne.s32.totalorder %s276_s10, %s532_s2  ;;  %p538_p12 = scmp.lt.s32.totalorder %s532_s2, %s532_s2 }
  0x43   :  { %409 = vmatprep.subr.bf16.mxu0 %v408_v21  ;;  %v456_v51 = vpack.c.bf16 %v181_v50, %v180_v49 }
  0x44   :  { %p539_p13 = por %p538_p12, %p537_p11 }
  0x45   :  { %439 = vmatpush3.bf16.msra.mxu1 %v436_v24 }
  0x46   :  { %411 = vmatpush3.bf16.msra.mxu0 %v408_v21  ;;  %441 = vmatprep.subr.bf16.mxu1 %v440_v30  ;;  %p540_p0 = pnand %p539_p13, %p533_p10 }
  0x47   :  { %413 = vmatprep.subr.bf16.mxu0 %v412_v27 }
  0x49   :  { %443 = vmatpush3.bf16.msra.mxu1 %v440_v30 }
  0x4a   :  { %415 = vmatpush3.bf16.msra.mxu0 %v412_v27  ;;  %445 = vmatprep.subr.bf16.mxu1 %v444_v36 }
  0x4b   :  { %417 = vmatprep.subr.bf16.mxu0 %v416_v33 }
  0x4d   :  { %447 = vmatpush3.bf16.msra.mxu1 %v444_v36 }
  0x4e   :  { %419 = vmatpush3.bf16.msra.mxu0 %v416_v33  ;;  %449 = vmatprep.subr.bf16.mxu1 %v448_v42 }
  0x4f   :  { %421 = vmatprep.subr.bf16.mxu0 %v420_v39 }
  0x51   :  { %451 = vmatpush3.bf16.msra.mxu1 %v448_v42 }
  0x52   :  { %423 = vmatpush3.bf16.msra.mxu0 %v420_v39  ;;  %453 = vmatprep.subr.bf16.mxu1 %v452_v46 }
  0x53   :  { %425 = vmatprep.subr.bf16.mxu0 %v424_v45 }
  0x55   :  { %455 = vmatpush3.bf16.msra.mxu1 %v452_v46 }
  0x56   :  { %427 = vmatpush3.bf16.msra.mxu0 %v424_v45  ;;  %457 = vmatprep.subr.bf16.mxu1 %v456_v51 }
  0x59   :  { %359 = vmatmul.mubr.f32.vlgmr.msra.gmra.mrb[0].mxu0 %v65_v48  ;;  %459 = vmatpush3.bf16.msra.mxu1 %v456_v51 }
 0x12c   :  { %v360_v53 = vpop.f32.mrb[0].mxu0 }
 0x12d   :  { %v161_v54 = vadd.f32 %v360_v53, %v288_v52  ;;  %v155_v55 = vpop.f32.mrb[1].mxu0 }
 0x12e   :  { %v156_v56 = vadd.f32 %v288_v52, %v155_v55 }
 0x12f   :  { %v165_v58 = vmax.f32 %v161_v54, 0.0 }
 0x130   :  { %v164_v57 = vmax.f32 %v156_v56, 0.0 }
 0x132   :  { %393 = vmatprep.mubr.f32.mxu1 %v164_v57 }
 0x133   :  { %394 = vmatmul.mubr.f32.vlgmr.msra.gmra.mrb[0].mxu1 %v165_v58 }
 0x206   :  { %v395_v59 = vpop.f32.mrb[0].mxu1 }
 0x207   :  { %v258_v61 = vadd.f32 %v395_v59, %v63_v47  ;;  %v248_v62 = vpop.f32.mrb[1].mxu1 }
 0x208   :  { %v257_v63 = vadd.f32 %v248_v62, %v648_v11 }
 0x209   :  { %v267_v0 = vadd.f32 %v289_v60, %v258_v61 }
 0x20a   :  { %v266_v1 = vadd.f32 %v289_v60, %v257_v63 }
 0x20b   :  { %269 = vst [vmem:[#allocation8 + $0x8] sm:$0xff] %v267_v0 }
 0x20c   :  { %268 = vst [vmem:[#allocation8] sm:$0xff] %v266_v1 }
 0x20d   :  { %543 = shalt.err (!%p540_p0)
}
 0x20e   :  { %s544_s12 = scalar_lea.hbm %s678_s5, 256 }
 0x20f   :  { %p545_p1 = scmp.ne.s32.totalorder %s678_s5, %s544_s12  ;;  %p548_p2 = scmp.lt.u32.totalorder %s544_s12, %s678_s5 }
 0x211   :  { %p550_p3 = pnand %p548_p2, %p545_p1 }
 0x213   :  { %553 = shalt.err (!%p550_p3)
}
 0x214   :  { %281 = dma.vmem_to_hbm [thread:$0]  %s276_s10, 256, %s678_s5, [#allocation4], %s562_s30, %s562_s30, %s563_s6  }
 0x215   :  { %558 = dma.done.wait [#allocation4], 256  }
 0x216   :  { %559 = vsyncadd [#allocation4], 4294967040 }
 0x217   :  { %285 = vsyncpa [#allocation3], 1 }
 0x218   :  { %286 = vsyncpa [#allocation6], 1 }
 0x219   :  { %287 = vsyncpa [#allocation4], 1 }

</bundles_post_ra>
